<compile_context>
chip_gen: v5e
topology: v5e:2x2
jax: 0.10.0
libtpu: 0.0.40
codegen_flags: <defaults>
</compile_context>

<pallas_src>
import jax
import jax.numpy as jnp
from jax.experimental import pallas as pl
from jax.experimental.pallas import tpu as pltpu


def _box_sdf_kernel(params_ref, pts_ref, out_ref):
    # params_ref: SMEM (15,) f32
    #   [0:9]   rotmat R[i, j] flattened row-major
    #   [9:12]  off_j   = sum_i center_i * R[i, j]
    #   [12:15] half_j  = side_lengths_j / 2
    # pts_ref   : VMEM (3, TR, 128) f32   (x / y / z planes of TR*128 points)
    # out_ref   : VMEM (TR, 128) f32
    p0 = pts_ref[0]  # (TR, 128)
    p1 = pts_ref[1]
    p2 = pts_ref[2]

    diffs = []
    for j in range(3):
        # point_local[:, j] = sum_i p_i * R[i, j] - off_j   (center folded in)
        loc_j = (p0 * params_ref[0 * 3 + j]
                 + p1 * params_ref[1 * 3 + j]
                 + p2 * params_ref[2 * 3 + j]
                 - params_ref[9 + j])
        diffs.append(jnp.abs(loc_j) - params_ref[12 + j])

    zero = jnp.zeros_like(diffs[0])
    c0 = jnp.maximum(diffs[0], zero)
    c1 = jnp.maximum(diffs[1], zero)
    c2 = jnp.maximum(diffs[2], zero)
    outside = jnp.sqrt(c0 * c0 + c1 * c1 + c2 * c2)
    inside = jnp.minimum(jnp.maximum(jnp.maximum(diffs[0], diffs[1]), diffs[2]), zero)
    out_ref[...] = outside + inside


def _box_sdf_xla(pts, center, rotmat, side_lengths):
    """Pure-XLA fast path for small N (and reference formula)."""
    point_local = (pts - center.reshape(1, 3)) @ rotmat.reshape(3, 3)
    diff = jnp.abs(point_local) - side_lengths.reshape(1, 3) * 0.5
    sd = (jnp.linalg.norm(jnp.maximum(diff, 0.0), axis=-1)
          + jnp.minimum(jnp.max(diff, axis=-1), 0.0))
    return sd[:, None]


def box_sdf_forward(points, center, rotmat, side_lengths, *,
                    block_rows=64, force_kernel=False,
                    small_n_threshold=65536):
    """points: (..., 3) -> signed distance (N, 1), N = prod(leading dims)."""
    pts = points.reshape(-1, 3).astype(jnp.float32)
    center = jnp.asarray(center, jnp.float32).reshape(3)
    rotmat = jnp.asarray(rotmat, jnp.float32).reshape(3, 3)
    side = jnp.asarray(side_lengths, jnp.float32).reshape(3)
    n = pts.shape[0]

    # Small-N fast path: kernel launch + repack would dominate the work.
    if not force_kernel and n < small_n_threshold:
        return _box_sdf_xla(pts, center, rotmat, side)

    # --- layout: split point index into (row, lane), 128 points per lane row.
    rows = pl.cdiv(n, 128)
    rows8 = ((rows + 7) // 8) * 8            # sublane multiple
    tr = min(block_rows, rows8)              # block_rows must be a multiple of 8
    rows_pad = ((rows8 + tr - 1) // tr) * tr
    n_pad = rows_pad * 128

    # Single fused pad + transpose + reshape (no zeros+scatter).
    pts_soa = jnp.pad(pts, ((0, n_pad - n), (0, 0))).T.reshape(3, rows_pad, 128)

    # Scalar parameter table (SMEM): rotmat, folded-center offset, half-sides.
    off = center @ rotmat                    # off_j = sum_i c_i * R[i, j]
    params = jnp.concatenate([rotmat.reshape(9), off, side * 0.5]).astype(jnp.float32)

    out = pl.pallas_call(
        _box_sdf_kernel,
        out_shape=jax.ShapeDtypeStruct((rows_pad, 128), jnp.float32),
        grid=(rows_pad // tr,),
        in_specs=[
            pl.BlockSpec(memory_space=pltpu.MemorySpace.SMEM),     # params (whole)
            pl.BlockSpec((3, tr, 128), lambda i: (0, i, 0)),        # point planes
        ],
        out_specs=pl.BlockSpec((tr, 128), lambda i: (i, 0)),
        compiler_params=pltpu.CompilerParams(
            dimension_semantics=("parallel",)),
    )(params, pts_soa)

    # Padded tail rows contain garbage SDF values for zero-padded points; the
    # slice below removes them — never return `out` unsliced.
    return out.reshape(-1)[:n].reshape(n, 1)


def box_sdf_reference(points, center, rotmat, side_lengths):
    pts = points.reshape(-1, 3).astype(jnp.float32)
    return _box_sdf_xla(pts,
                        jnp.asarray(center, jnp.float32).reshape(3),
                        jnp.asarray(rotmat, jnp.float32).reshape(3, 3),
                        jnp.asarray(side_lengths, jnp.float32).reshape(3))


if __name__ == "__main__":
    # Deterministic, non-trivial parameters (shapes match module __init__):
    # center (1,3) -> stored as (3,), rotmat (3,3), side_lengths (1,3) -> (3,)
    theta = jnp.float32(jnp.pi / 6.0)  # 30 deg rotation about z
    c, s = jnp.cos(theta), jnp.sin(theta)
    rotmat = jnp.array([[c, -s, 0.0],
                        [s,  c, 0.0],
                        [0.0, 0.0, 1.0]], dtype=jnp.float32)
    center = jnp.array([0.1, -0.2, 0.3], dtype=jnp.float32)
    side_lengths = jnp.array([1.75, 1.5, 2.0], dtype=jnp.float32)

    # Example query points: (2, 128, 3) uniform in [-2, 2] -> N = 256
    key = jax.random.PRNGKey(0)
    points = jax.random.uniform(key, (2, 128, 3), jnp.float32, minval=-2.0, maxval=2.0)

    ref = box_sdf_reference(points, center, rotmat, side_lengths)

    # Force the Pallas kernel path (small N would otherwise take the fast path).
    out = box_sdf_forward(points, center, rotmat, side_lengths, force_kernel=True)
    out = jax.block_until_ready(out)
    assert out.shape == (points.shape[0] * points.shape[1], 1)
    assert jnp.allclose(out, ref, atol=5e-5, rtol=1e-5), (
        f"kernel max abs err = {jnp.max(jnp.abs(out - ref))}")

    # Also check the small-N XLA fast path used by default at this size.
    out_fast = jax.block_until_ready(
        box_sdf_forward(points, center, rotmat, side_lengths))
    assert jnp.allclose(out_fast, ref, atol=5e-5, rtol=1e-5)

    print("KERNEL_OK")
</pallas_src>

<mosaic_0001>
module attributes {stable_mosaic.version = 11 : i64} {
  func.func @_box_sdf_kernel(%arg0: i32, %arg1: memref<15xf32, #tpu.memory_space<smem>>, %arg2: memref<3x8x128xf32, #tpu.memory_space<vmem>>, %arg3: memref<8x128xf32, #tpu.memory_space<vmem>>) attributes {dimension_semantics = [#tpu.dimension_semantics<parallel>], iteration_bounds = array<i64: 1>, scalar_prefetch = 0 : i64, scratch_operands = 0 : i64, tpu.core_type = #tpu.core_type<tc>, window_params = [{transform_indices = @transform_0, window_bounds = array<i64: 15>}, {transform_indices = @transform_1, window_bounds = array<i64: 3, 8, 128>}, {transform_indices = @transform_2, window_bounds = array<i64: 8, 128>}]} {
    %c0 = arith.constant 0 : index
    %c0_0 = arith.constant 0 : index
    %c0_1 = arith.constant 0 : index
    %0 = vector.load %arg2[%c0, %c0_0, %c0_1] : memref<3x8x128xf32, #tpu.memory_space<vmem>>, vector<1x8x128xf32>
    %1 = vector.shape_cast %0 : vector<1x8x128xf32> to vector<8x128xf32>
    %c1 = arith.constant 1 : index
    %c0_2 = arith.constant 0 : index
    %c0_3 = arith.constant 0 : index
    %2 = vector.load %arg2[%c1, %c0_2, %c0_3] : memref<3x8x128xf32, #tpu.memory_space<vmem>>, vector<1x8x128xf32>
    %3 = vector.shape_cast %2 : vector<1x8x128xf32> to vector<8x128xf32>
    %c2 = arith.constant 2 : index
    %c0_4 = arith.constant 0 : index
    %c0_5 = arith.constant 0 : index
    %4 = vector.load %arg2[%c2, %c0_4, %c0_5] : memref<3x8x128xf32, #tpu.memory_space<vmem>>, vector<1x8x128xf32>
    %5 = vector.shape_cast %4 : vector<1x8x128xf32> to vector<8x128xf32>
    %c0_6 = arith.constant 0 : index
    %6 = memref.load %arg1[%c0_6] : memref<15xf32, #tpu.memory_space<smem>>
    %7 = vector.broadcast %6 : f32 to vector<8x128xf32>
    %8 = arith.mulf %1, %7 : vector<8x128xf32>
    %c3 = arith.constant 3 : index
    %9 = memref.load %arg1[%c3] : memref<15xf32, #tpu.memory_space<smem>>
    %10 = vector.broadcast %9 : f32 to vector<8x128xf32>
    %11 = arith.mulf %3, %10 : vector<8x128xf32>
    %12 = arith.addf %8, %11 : vector<8x128xf32>
    %c6 = arith.constant 6 : index
    %13 = memref.load %arg1[%c6] : memref<15xf32, #tpu.memory_space<smem>>
    %14 = vector.broadcast %13 : f32 to vector<8x128xf32>
    %15 = arith.mulf %5, %14 : vector<8x128xf32>
    %16 = arith.addf %12, %15 : vector<8x128xf32>
    %c9 = arith.constant 9 : index
    %17 = memref.load %arg1[%c9] : memref<15xf32, #tpu.memory_space<smem>>
    %18 = vector.broadcast %17 : f32 to vector<8x128xf32>
    %19 = arith.subf %16, %18 : vector<8x128xf32>
    %20 = math.absf %19 : vector<8x128xf32>
    %c12 = arith.constant 12 : index
    %21 = memref.load %arg1[%c12] : memref<15xf32, #tpu.memory_space<smem>>
    %22 = vector.broadcast %21 : f32 to vector<8x128xf32>
    %23 = arith.subf %20, %22 : vector<8x128xf32>
    %c1_7 = arith.constant 1 : index
    %24 = memref.load %arg1[%c1_7] : memref<15xf32, #tpu.memory_space<smem>>
    %25 = vector.broadcast %24 : f32 to vector<8x128xf32>
    %26 = arith.mulf %1, %25 : vector<8x128xf32>
    %c4 = arith.constant 4 : index
    %27 = memref.load %arg1[%c4] : memref<15xf32, #tpu.memory_space<smem>>
    %28 = vector.broadcast %27 : f32 to vector<8x128xf32>
    %29 = arith.mulf %3, %28 : vector<8x128xf32>
    %30 = arith.addf %26, %29 : vector<8x128xf32>
    %c7 = arith.constant 7 : index
    %31 = memref.load %arg1[%c7] : memref<15xf32, #tpu.memory_space<smem>>
    %32 = vector.broadcast %31 : f32 to vector<8x128xf32>
    %33 = arith.mulf %5, %32 : vector<8x128xf32>
    %34 = arith.addf %30, %33 : vector<8x128xf32>
    %c10 = arith.constant 10 : index
    %35 = memref.load %arg1[%c10] : memref<15xf32, #tpu.memory_space<smem>>
    %36 = vector.broadcast %35 : f32 to vector<8x128xf32>
    %37 = arith.subf %34, %36 : vector<8x128xf32>
    %38 = math.absf %37 : vector<8x128xf32>
    %c13 = arith.constant 13 : index
    %39 = memref.load %arg1[%c13] : memref<15xf32, #tpu.memory_space<smem>>
    %40 = vector.broadcast %39 : f32 to vector<8x128xf32>
    %41 = arith.subf %38, %40 : vector<8x128xf32>
    %c2_8 = arith.constant 2 : index
    %42 = memref.load %arg1[%c2_8] : memref<15xf32, #tpu.memory_space<smem>>
    %43 = vector.broadcast %42 : f32 to vector<8x128xf32>
    %44 = arith.mulf %1, %43 : vector<8x128xf32>
    %c5 = arith.constant 5 : index
    %45 = memref.load %arg1[%c5] : memref<15xf32, #tpu.memory_space<smem>>
    %46 = vector.broadcast %45 : f32 to vector<8x128xf32>
    %47 = arith.mulf %3, %46 : vector<8x128xf32>
    %48 = arith.addf %44, %47 : vector<8x128xf32>
    %c8 = arith.constant 8 : index
    %49 = memref.load %arg1[%c8] : memref<15xf32, #tpu.memory_space<smem>>
    %50 = vector.broadcast %49 : f32 to vector<8x128xf32>
    %51 = arith.mulf %5, %50 : vector<8x128xf32>
    %52 = arith.addf %48, %51 : vector<8x128xf32>
    %c11 = arith.constant 11 : index
    %53 = memref.load %arg1[%c11] : memref<15xf32, #tpu.memory_space<smem>>
    %54 = vector.broadcast %53 : f32 to vector<8x128xf32>
    %55 = arith.subf %52, %54 : vector<8x128xf32>
    %56 = math.absf %55 : vector<8x128xf32>
    %c14 = arith.constant 14 : index
    %57 = memref.load %arg1[%c14] : memref<15xf32, #tpu.memory_space<smem>>
    %58 = vector.broadcast %57 : f32 to vector<8x128xf32>
    %59 = arith.subf %56, %58 : vector<8x128xf32>
    %cst = arith.constant 0.000000e+00 : f32
    %60 = vector.broadcast %cst : f32 to vector<8x128xf32>
    %61 = arith.maximumf %23, %60 : vector<8x128xf32>
    %62 = arith.maximumf %41, %60 : vector<8x128xf32>
    %63 = arith.maximumf %59, %60 : vector<8x128xf32>
    %64 = arith.mulf %61, %61 : vector<8x128xf32>
    %65 = arith.mulf %62, %62 : vector<8x128xf32>
    %66 = arith.addf %64, %65 : vector<8x128xf32>
    %67 = arith.mulf %63, %63 : vector<8x128xf32>
    %68 = arith.addf %66, %67 : vector<8x128xf32>
    %69 = math.sqrt %68 : vector<8x128xf32>
    %70 = arith.maximumf %23, %41 : vector<8x128xf32>
    %71 = arith.maximumf %70, %59 : vector<8x128xf32>
    %72 = arith.minimumf %71, %60 : vector<8x128xf32>
    %73 = arith.addf %69, %72 : vector<8x128xf32>
    %c0_9 = arith.constant 0 : index
    %c0_10 = arith.constant 0 : index
    %74 = vector.load %arg3[%c0_9, %c0_10] : memref<8x128xf32, #tpu.memory_space<vmem>>, vector<8x128xf32>
    tpu.vector_store %arg3[%c0_9, %c0_10], %73 {strides = array<i32>} : memref<8x128xf32, #tpu.memory_space<vmem>>, vector<8x128xf32>,
    return
  }
  func.func @transform_0(%arg0: i32) -> i32 {
    %c0_i32 = arith.constant 0 : i32
    %c0_i32_0 = arith.constant 0 : i32
    return %c0_i32 : i32
  }
  func.func @transform_1(%arg0: i32) -> (i32, i32, i32) {
    %c0_i32 = arith.constant 0 : i32
    %c0_i32_0 = arith.constant 0 : i32
    %c0_i32_1 = arith.constant 0 : i32
    return %c0_i32, %arg0, %c0_i32_0 : i32, i32, i32
  }
  func.func @transform_2(%arg0: i32) -> (i32, i32) {
    %c0_i32 = arith.constant 0 : i32
    %c0_i32_0 = arith.constant 0 : i32
    return %arg0, %c0_i32 : i32, i32
  }
}

</mosaic_0001>

<bundles_post_ra>
// kernel: tpu_custom_call.1
= control target key start
LH: loop header
LB: loop body
LE: loop exit
PB: predicated region body
PF: predicated region fallthrough
CT: control target
= control target key end

     0   :  { %7 = vsyncpa [#allocation5], 0  ;;  %s265_s0 = inlined_call_operand.hbm [shape: f32[15], index: 0, kind: input, shape index: {}]   ;;  %s266_s1 = inlined_call_operand.hbm [shape: f32[3,8,128], index: 1, kind: input, shape index: {}]   ;;  %s267_s2 = inlined_call_operand.hbm [shape: f32[8,128], index: 2, kind: output, shape index: {}]  }
   0x1   :  { %8 = vsyncpa [#allocation3], 0 }
   0x2   :  { %9 = vsyncpa [#allocation4], 0  ;;  %s15_s11 = sshll.u32 %s265_s0, 4  ;;  %s23_s14 = sshll.u32 %s266_s1, 4  ;;  %s16_s11 = int_to_ptr.hbm [resolvable:$true] %s15_s11  ;;  %s24_s14 = int_to_ptr.hbm [resolvable:$true] %s23_s14 }
   0x3   :  { %s230_s15 = smov [#allocation2]   ;;  %s231_s16 = smov [#allocation6]  }
   0x4   :  { %18 = dma.hbm_to_smem %s16_s11, 16, %s230_s15, [#allocation5]  }
   0x5   :  { %s25_s17 = sshll.u32 %s231_s16, 4  ;;  %s232_s18 = smov 128   ;;  %s26_s17 = int_to_ptr.vmem [resolvable:$true] %s25_s17 }
   0x6   :  { %s233_s19 = smov 8  }
   0x7   :  { %31 = dma.hbm_to_vmem [thread:$0]  %s24_s14, 384, %s26_s17, [#allocation3], %s232_s18, %s232_s18, %s233_s19  }
   0x8   :  { %224 = dma.done.wait [#allocation5], 16  }
   0x9   :  { %225 = vsyncadd [#allocation5], 4294967280 }
   0xa   :  { %226 = dma.done.wait [#allocation3], 384  }
   0xb   :  { %227 = vsyncadd [#allocation3], 4294966912 }
   0xc   :  { %40 = sfence }
   0xd   :  { %s46_s0 = sld [smem:[#allocation2]]  ;;  %v41_v0 = vld [vmem:[#allocation6] sm:$0xff]  ;;  %v43_v1 = vld [vmem:[#allocation6 + $0x8] sm:$0xff]  ;;  %v45_v2 = vld [vmem:[#allocation6 + $0x10] sm:$0xff]  ;;  %s234_s5 = smov [#allocation7]  }
   0xe   :  { %s143_s20 = sld [smem:[#allocation2 + $0x3]]  ;;  %s130_s6 = sshll.u32 %s234_s5, 4  ;;  %s131_s6 = int_to_ptr.vmem [resolvable:$true] %s130_s6 }
   0xf   :  { %s144_s21 = sld [smem:[#allocation2 + $0x6]]  ;;  %s132_s9 = sshll.u32 %s267_s2, 4  ;;  %s133_s9 = int_to_ptr.hbm [resolvable:$true] %s132_s9 }
  0x10   :  { %s145_s22 = sld [smem:[#allocation2 + $0x9]] }
  0x11   :  { %s256_s1 = sld [smem:[#allocation2 + $0xc]] }
  0x12   :  { %s147_s23 = sld [smem:[#allocation2 + $0x1]] }
  0x13   :  { %v47_v3 = vstv %s46_s0  ;;  %s148_s24 = sld [smem:[#allocation2 + $0x4]] }
  0x14   :  { %v48_v4 = vmul.f32 %v47_v3, %v41_v0  ;;  %v50_v5 = vstv %s143_s20  ;;  %s149_s25 = sld [smem:[#allocation2 + $0x7]] }
  0x15   :  { %v51_v6 = vmul.f32 %v50_v5, %v43_v1  ;;  %v54_v7 = vstv %s144_s21  ;;  %s150_s26 = sld [smem:[#allocation2 + $0xa]] }
  0x16   :  { %v55_v8 = vmul.f32 %v54_v7, %v45_v2  ;;  %s258_s27 = sld [smem:[#allocation2 + $0xd]]  ;;  %v58_v10 = vstv %s145_s22 }
  0x17   :  { %v52_v9 = vadd.f32 %v51_v6, %v48_v4  ;;  %s152_s28 = sld [smem:[#allocation2 + $0x2]]  ;;  %v62_v19 = vstv %s256_s1 }
  0x18   :  { %v65_v11 = vstv %s147_s23  ;;  %s153_s29 = sld [smem:[#allocation2 + $0x5]] }
  0x19   :  { %v56_v12 = vadd.f32 %v55_v8, %v52_v9  ;;  %v66_v13 = vmul.f32 %v65_v11, %v41_v0  ;;  %v68_v14 = vstv %s148_s24  ;;  %s154_s30 = sld [smem:[#allocation2 + $0x8]] }
  0x1a   :  { %v69_v15 = vmul.f32 %v68_v14, %v43_v1  ;;  %v72_v16 = vstv %s149_s25  ;;  %s155_s3 = sld [smem:[#allocation2 + $0xb]] }
  0x1b   :  { %v59_v17 = vsub.f32 %v56_v12, %v58_v10  ;;  %v73_v18 = vmul.f32 %v72_v16, %v45_v2  ;;  %v76_v22 = vstv %s150_s26  ;;  %s156_s4 = sld [smem:[#allocation2 + $0xe]] }
  0x1c   :  { %v70_v20 = vadd.f32 %v69_v15, %v66_v13  ;;  %v80_v32 = vstv %s258_s27 }
  0x1d   :  { %v60_v21 = vand.u32 2147483647, %v59_v17  ;;  %v83_v23 = vstv %s152_s28 }
  0x1e   :  { %v74_v24 = vadd.f32 %v73_v18, %v70_v20  ;;  %v84_v25 = vmul.f32 %v83_v23, %v41_v0  ;;  %v86_v26 = vstv %s153_s29 }
  0x1f   :  { %v63_v27 = vsub.f32 %v60_v21, %v62_v19  ;;  %v87_v28 = vmul.f32 %v86_v26, %v43_v1  ;;  %v90_v29 = vstv %s154_s30 }
  0x20   :  { %v77_v30 = vsub.f32 %v74_v24, %v76_v22  ;;  %v91_v31 = vmul.f32 %v90_v29, %v45_v2  ;;  %v94_v35 = vstv %s155_s3 }
  0x21   :  { %v88_v33 = vadd.f32 %v87_v28, %v84_v25  ;;  %v100_v37 = vmax.f32 %v63_v27, 0.0  ;;  %v98_v40 = vstv %s156_s4 }
  0x22   :  { %v78_v34 = vand.u32 2147483647, %v77_v30 }
  0x23   :  { %v92_v36 = vadd.f32 %v91_v31, %v88_v33  ;;  %v103_v43 = vmul.f32 %v100_v37, %v100_v37 }
  0x24   :  { %v81_v38 = vsub.f32 %v78_v34, %v80_v32 }
  0x25   :  { %v95_v39 = vsub.f32 %v92_v36, %v94_v35 }
  0x26   :  { %v101_v41 = vmax.f32 %v81_v38, 0.0  ;;  %v120_v53 = vmax.f32 %v63_v27, %v81_v38 }
  0x27   :  { %v96_v42 = vand.u32 2147483647, %v95_v39 }
  0x28   :  { %v104_v44 = vmul.f32 %v101_v41, %v101_v41 }
  0x29   :  { %v99_v45 = vsub.f32 %v96_v42, %v98_v40 }
  0x2a   :  { %v105_v47 = vadd.f32 %v104_v44, %v103_v43 }
  0x2b   :  { %v102_v46 = vmax.f32 %v99_v45, 0.0  ;;  %v121_v56 = vmax.f32 %v120_v53, %v99_v45 }
  0x2d   :  { %v106_v48 = vmul.f32 %v102_v46, %v102_v46  ;;  %v122_v60 = vmin.f32 %v121_v56, 0.0 }
  0x2f   :  { %v107_v49 = vadd.f32 %v106_v48, %v105_v47 }
  0x31   :  { %162 = vrsqrt.f32 %v107_v49  ;;  %vm115_vm0 = vcmp.eq.f32.partialorder %v107_v49, inf  ;;  %v118_v58 = vand.u32 2147483648, %v107_v49  ;;  %vm117_vm1 = vcmp.eq.f32.partialorder %v107_v49, 0.0 }
  0x37   :  { %v163_v50 = vpop.eup %162 }
  0x38   :  { %v109_v51 = vmul.f32 %v163_v50, %v107_v49 }
  0x3a   :  { %v110_v52 = vmul.f32 %v163_v50, %v109_v51 }
  0x3c   :  { %v111_v54 = vmul.f32 0.5, %v110_v52 }
  0x3e   :  { %v112_v55 = vsub.f32 1.5, %v111_v54 }
  0x40   :  { %v113_v57 = vmul.f32 %v163_v50, %v112_v55 }
  0x42   :  { %v114_v59 = vmul.f32 %v113_v57, %v107_v49 }
  0x44   :  { %v116_v61 = vsel %vm115_vm0, %v107_v49, %v114_v59 }
  0x45   :  { %v119_v62 = vsel %vm117_vm1, %v118_v58, %v116_v61 }
  0x46   :  { %v123_v63 = vadd.f32 %v122_v60, %v119_v62 }
  0x48   :  { %124 = vst [vmem:[#allocation7] sm:$0xff] %v123_v63 }
  0x49   :  { %135 = dma.vmem_to_hbm [thread:$0]  %s131_s6, 128, %s133_s9, [#allocation4]  }
  0x4a   :  { %228 = dma.done.wait [#allocation4], 128  }
  0x4b   :  { %229 = vsyncadd [#allocation4], 4294967168 }
  0x4c   :  { %140 = vsyncpa [#allocation3], 1 }
  0x4d   :  { %141 = vsyncpa [#allocation4], 1 }
  0x4e   :  { %142 = vsyncpa [#allocation5], 1 }

</bundles_post_ra>
